<compile_context>
chip_gen: v7x
topology: tpu7x:2x2x1
jax: 0.10.0
libtpu: 0.0.40
codegen_flags: <defaults>
</compile_context>

<pallas_src>
from functools import reduce

import jax
import jax.numpy as jnp
from jax.experimental import pallas as pl
from jax.experimental.pallas import tpu as pltpu


def _round_up(x: int, m: int) -> int:
    return ((x + m - 1) // m) * m


_SMALL_OBS_DIM = 128   # flattened obs below this get merged into one operand


# ---------------------------------------------------------------------------
# Pallas kernel factory: fused (split-K concat) MLP + value head
# ---------------------------------------------------------------------------
def _make_mlp_value_kernel(n_groups: int, n_hidden: int, non_lin):
    def kernel(*refs):
        x_refs = refs[:n_groups]                 # (TB, D_g) f32 per obs group
        w1_refs = refs[n_groups:2 * n_groups]    # (D_g, H1) bf16 per obs group
        idx = 2 * n_groups
        b1_ref = refs[idx]; idx += 1             # (1, H1)  f32

        # Layer 1: concat is fused as a split-K sum of per-group matmuls.
        # Observations arrive f32 and are cast to bf16 on the VPU here
        # (bf16 MXU operands, f32 accumulation).
        h = jnp.dot(x_refs[0][...].astype(jnp.bfloat16), w1_refs[0][...],
                    preferred_element_type=jnp.float32)
        for xr, wr in zip(x_refs[1:], w1_refs[1:]):
            h = h + jnp.dot(xr[...].astype(jnp.bfloat16), wr[...],
                            preferred_element_type=jnp.float32)
        h = non_lin(h + b1_ref[...])

        # Remaining hidden layers.
        for _ in range(n_hidden - 1):
            w_ref = refs[idx]; b_ref = refs[idx + 1]; idx += 2
            h = jnp.dot(h.astype(jnp.bfloat16), w_ref[...],
                        preferred_element_type=jnp.float32)
            h = non_lin(h + b_ref[...])

        wv_ref = refs[idx]       # (1, H_last) f32
        bv_ref = refs[idx + 1]   # (1,) f32 in SMEM
        out_ref = refs[idx + 2]  # (TB, 1) f32

        # Value head (output_units=1) on VPU multiply + XLU lane-reduce,
        # stored directly as a (TB, 1) column (no broadcast slab).
        out_ref[...] = (jnp.sum(h * wv_ref[...], axis=-1, keepdims=True)
                        + bv_ref[0])

    return kernel


# ---------------------------------------------------------------------------
# pallas_call wrapper: batch-tiled grid, resident weights, compact output
# ---------------------------------------------------------------------------
def mlp_value_pallas(x_list, w1_list, b1, extra_layers, wv, bv,
                     *, non_lin=jnp.tanh, tb_max=2048):
    """x_list: list of (B, D_g) f32 flattened observation groups -> (B, 1) f32."""
    n_groups = len(x_list)
    n_hidden = 1 + len(extra_layers)
    B = x_list[0].shape[0]

    # Batch tile: multiple of 16, as large as possible (amortize the ~0.35us
    # per-grid-step overhead), but capped so that the grid gets >= 2 steps
    # whenever the padded batch allows it (megacore sharding on v7x).
    b16 = _round_up(max(B, 16), 16)
    TB = min(tb_max, b16)
    if b16 >= 32:
        TB = min(TB, _round_up((b16 + 1) // 2, 16))
    B_pad = _round_up(B, TB)
    if B_pad != B:
        x_list = [jnp.pad(x, ((0, B_pad - B), (0, 0))) for x in x_list]
    grid = (B_pad // TB,)

    def batch_spec(d):
        return pl.BlockSpec((TB, d), lambda i: (i, 0))

    def resident(shape):
        # Constant index map -> block stays VMEM-resident across grid steps.
        return pl.BlockSpec(shape, lambda i: (0,) * len(shape))

    in_specs = [batch_spec(x.shape[1]) for x in x_list]
    in_specs += [resident(w.shape) for w in w1_list]
    in_specs.append(resident(b1.shape))
    args = list(x_list) + list(w1_list) + [b1]
    for w, b in extra_layers:
        in_specs += [resident(w.shape), resident(b.shape)]
        args += [w, b]
    in_specs.append(resident(wv.shape))
    in_specs.append(pl.BlockSpec(memory_space=pltpu.MemorySpace.SMEM))  # bv scalar
    args += [wv, bv]

    out = pl.pallas_call(
        _make_mlp_value_kernel(n_groups, n_hidden, non_lin),
        out_shape=jax.ShapeDtypeStruct((B_pad, 1), jnp.float32),
        grid=grid,
        in_specs=in_specs,
        out_specs=pl.BlockSpec((TB, 1), lambda i: (i, 0)),
        compiler_params=pltpu.CompilerParams(
            dimension_semantics=("parallel",)),   # v7x: shard batch over 2 TCs
    )(*args)

    return out[:B]


# ---------------------------------------------------------------------------
# Parameter init (normc, as in make_module_init_normc; biases zero)
# ---------------------------------------------------------------------------
def _normc_init(key, in_dim, out_dim, std):
    w = jax.random.normal(key, (in_dim, out_dim), dtype=jnp.float32)
    w = w * std / jnp.sqrt(jnp.sum(jnp.square(w), axis=0, keepdims=True))
    b = jnp.zeros((1, out_dim), dtype=jnp.float32)
    return w, b


# ---------------------------------------------------------------------------
# Model wrapper: flatten (plain reshape) + fused Pallas MLP/value kernel
# ---------------------------------------------------------------------------
class FlattenConcatStateValueNetPallas:
    """Pallas-TPU port of maze FlattenConcatStateValueNet (non_lin = tanh)."""

    def __init__(self, obs_shapes, hidden_units, key, non_lin=jnp.tanh):
        self.obs_shapes = dict(obs_shapes)
        self.hidden_units = list(hidden_units)
        self.non_lin = non_lin
        self.obs_dims = {n: int(reduce(lambda a, b: a * b, s, 1))
                         for n, s in self.obs_shapes.items()}
        d_in = sum(self.obs_dims.values())

        # Group observations: large obs keep their own split-K matmul; tiny
        # obs (mostly MXU bubble at K < 128) are merged into one operand.
        small = [n for n in self.obs_shapes if self.obs_dims[n] < _SMALL_OBS_DIM]
        self.obs_groups = [[n] for n in self.obs_shapes
                           if self.obs_dims[n] >= _SMALL_OBS_DIM]
        if small:
            self.obs_groups.append(small)

        keys = jax.random.split(key, len(hidden_units) + 1)

        # Layer 1: normc over the full concatenated input dim (matches the
        # module), rows then regrouped per observation group.
        w1_full, b1 = _normc_init(keys[0], d_in, hidden_units[0], std=1.0)
        offsets, off = {}, 0
        for name in self.obs_shapes:
            offsets[name] = off
            off += self.obs_dims[name]
        self.w1_groups = []
        for grp in self.obs_groups:
            rows = jnp.concatenate(
                [w1_full[offsets[n]:offsets[n] + self.obs_dims[n]] for n in grp],
                axis=0)
            self.w1_groups.append(rows.astype(jnp.bfloat16))
        self.b1 = b1                                   # (1, H1) f32

        # Remaining hidden layers (bf16 weights for the MXU, f32 biases).
        # TODO(synk): pad hidden widths to 128/256 lanes if hidden_units ever
        # grow beyond toy size (irrelevant while HBM-bound).
        self.extra_layers = []
        prev = hidden_units[0]
        for i, h in enumerate(hidden_units[1:], start=1):
            w, b = _normc_init(keys[i], prev, h, std=1.0)
            self.extra_layers.append((w.astype(jnp.bfloat16), b))
            prev = h

        # Value head (output_units=1, std=0.01); stored (1, H_last) f32 for the
        # in-kernel VPU multiply + lane reduce.
        wv, _ = _normc_init(keys[-1], prev, 1, std=0.01)
        self.wv = wv.reshape(1, prev).astype(jnp.float32)
        self.bv = jnp.zeros((1,), dtype=jnp.float32)   # scalar bias -> SMEM

    def __call__(self, obs_dict):
        # FlattenBlock per observation (free reshape).  Observations stay f32;
        # the bf16 cast happens inside the kernel.  Only tiny obs within the
        # "small" group are concatenated wrapper-side (cheap by definition).
        flats = {n: obs_dict[n].reshape(obs_dict[n].shape[0], -1)
                 .astype(jnp.float32) for n in self.obs_shapes}
        xs = []
        for grp in self.obs_groups:
            if len(grp) == 1:
                xs.append(flats[grp[0]])
            else:
                xs.append(jnp.concatenate([flats[n] for n in grp], axis=-1))
        value = mlp_value_pallas(xs, self.w1_groups, self.b1,
                                 self.extra_layers, self.wv, self.bv,
                                 non_lin=self.non_lin)
        return {"value": value}


# ---------------------------------------------------------------------------
# Pure-JAX reference (mimics the kernel's bf16 operand rounding & grouping)
# ---------------------------------------------------------------------------
def reference_forward(model, obs_dict):
    flats = {n: obs_dict[n].reshape(obs_dict[n].shape[0], -1).astype(jnp.float32)
             for n in model.obs_shapes}
    cols = []
    for grp in model.obs_groups:
        cols += [flats[n] for n in grp]
    x = jnp.concatenate(cols, axis=-1)
    x = x.astype(jnp.bfloat16).astype(jnp.float32)
    w1 = jnp.concatenate([w.astype(jnp.float32) for w in model.w1_groups], axis=0)
    h = model.non_lin(x @ w1 + model.b1)
    for w, b in model.extra_layers:
        h_bf = h.astype(jnp.bfloat16).astype(jnp.float32)
        h = model.non_lin(h_bf @ w.astype(jnp.float32) + b)
    return h @ model.wv.T + model.bv


if __name__ == "__main__":
    key = jax.random.PRNGKey(0)
    k_img, k_vec, k_params = jax.random.split(key, 3)

    # Small observation space: an image-like obs (CHW) and a flat vector obs.
    obs_shapes = {
        "image": (4, 8, 8),   # -> 256 features after flatten (own MXU operand)
        "vector": (16,),      # -> 16 features (goes into the "small" group)
    }
    hidden_units = [32, 32]
    batch = 2

    obs = {
        "image": jax.random.normal(k_img, (batch, 4, 8, 8), dtype=jnp.float32),
        "vector": jax.random.normal(k_vec, (batch, 16), dtype=jnp.float32),
    }

    model = FlattenConcatStateValueNetPallas(obs_shapes, hidden_units, k_params)

    out = model(obs)
    value = jax.block_until_ready(out["value"])
    assert value.shape == (batch, 1), value.shape

    ref = reference_forward(model, obs)
    assert jnp.allclose(value, ref, atol=2e-3, rtol=2e-2), (value, ref)

    print("KERNEL_OK")
</pallas_src>

<mosaic_0001>
module attributes {stable_mosaic.version = 11 : i64} {
  func.func @kernel(%arg0: i32, %arg1: memref<16x256xf32, #tpu.memory_space<vmem>>, %arg2: memref<16x16xf32, #tpu.memory_space<vmem>>, %arg3: memref<256x32xbf16, #tpu.memory_space<vmem>>, %arg4: memref<16x32xbf16, #tpu.memory_space<vmem>>, %arg5: memref<1x32xf32, #tpu.memory_space<vmem>>, %arg6: memref<32x32xbf16, #tpu.memory_space<vmem>>, %arg7: memref<1x32xf32, #tpu.memory_space<vmem>>, %arg8: memref<1x32xf32, #tpu.memory_space<vmem>>, %arg9: memref<1xf32, #tpu.memory_space<smem>>, %arg10: memref<16x1xf32, #tpu.memory_space<vmem>>) attributes {dimension_semantics = [#tpu.dimension_semantics<parallel>], iteration_bounds = array<i64: 1>, scalar_prefetch = 0 : i64, scratch_operands = 0 : i64, tpu.core_type = #tpu.core_type<tc>, window_params = [{transform_indices = @transform_0, window_bounds = array<i64: 16, 256>}, {transform_indices = @transform_1, window_bounds = array<i64: 16, 16>}, {pipeline_mode = #tpu.pipeline_mode<synchronous>, transform_indices = @transform_2, window_bounds = array<i64: 256, 32>}, {pipeline_mode = #tpu.pipeline_mode<synchronous>, transform_indices = @transform_3, window_bounds = array<i64: 16, 32>}, {pipeline_mode = #tpu.pipeline_mode<synchronous>, transform_indices = @transform_4, window_bounds = array<i64: 1, 32>}, {pipeline_mode = #tpu.pipeline_mode<synchronous>, transform_indices = @transform_5, window_bounds = array<i64: 32, 32>}, {pipeline_mode = #tpu.pipeline_mode<synchronous>, transform_indices = @transform_6, window_bounds = array<i64: 1, 32>}, {pipeline_mode = #tpu.pipeline_mode<synchronous>, transform_indices = @transform_7, window_bounds = array<i64: 1, 32>}, {transform_indices = @transform_8, window_bounds = array<i64: 1>}, {transform_indices = @transform_9, window_bounds = array<i64: 16, 1>}]} {
    %c0 = arith.constant 0 : index
    %c0_0 = arith.constant 0 : index
    %0 = vector.load %arg1[%c0, %c0_0] : memref<16x256xf32, #tpu.memory_space<vmem>>, vector<16x256xf32>
    %1 = arith.truncf %0 : vector<16x256xf32> to vector<16x256xbf16>
    %c0_1 = arith.constant 0 : index
    %c0_2 = arith.constant 0 : index
    %2 = vector.load %arg3[%c0_1, %c0_2] : memref<256x32xbf16, #tpu.memory_space<vmem>>, vector<256x32xbf16>
    %cst = arith.constant dense<0.000000e+00> : vector<16x32xf32>
    %3 = tpu.matmul %1, %2, %cst {dimension_numbers = #tpu.dot_dimension_numbers<[1], [0], [0], [1], [0, 0, 1, 1], [], []>} : vector<16x256xbf16>, vector<256x32xbf16>, vector<16x32xf32> -> vector<16x32xf32>
    %c0_3 = arith.constant 0 : index
    %c0_4 = arith.constant 0 : index
    %4 = vector.load %arg2[%c0_3, %c0_4] : memref<16x16xf32, #tpu.memory_space<vmem>>, vector<16x16xf32>
    %5 = arith.truncf %4 : vector<16x16xf32> to vector<16x16xbf16>
    %c0_5 = arith.constant 0 : index
    %c0_6 = arith.constant 0 : index
    %6 = vector.load %arg4[%c0_5, %c0_6] : memref<16x32xbf16, #tpu.memory_space<vmem>>, vector<16x32xbf16>
    %cst_7 = arith.constant dense<0.000000e+00> : vector<16x32xf32>
    %7 = tpu.matmul %5, %6, %cst_7 {dimension_numbers = #tpu.dot_dimension_numbers<[1], [0], [0], [1], [0, 0, 1, 1], [], []>} : vector<16x16xbf16>, vector<16x32xbf16>, vector<16x32xf32> -> vector<16x32xf32>
    %8 = arith.addf %3, %7 : vector<16x32xf32>
    %c0_8 = arith.constant 0 : index
    %c0_9 = arith.constant 0 : index
    %9 = vector.load %arg5[%c0_8, %c0_9] : memref<1x32xf32, #tpu.memory_space<vmem>>, vector<1x32xf32>
    %10 = vector.broadcast %9 : vector<1x32xf32> to vector<16x32xf32>
    %11 = arith.addf %8, %10 : vector<16x32xf32>
    %12 = math.tanh %11 : vector<16x32xf32>
    %13 = arith.truncf %12 : vector<16x32xf32> to vector<16x32xbf16>
    %c0_10 = arith.constant 0 : index
    %c0_11 = arith.constant 0 : index
    %14 = vector.load %arg6[%c0_10, %c0_11] : memref<32x32xbf16, #tpu.memory_space<vmem>>, vector<32x32xbf16>
    %cst_12 = arith.constant dense<0.000000e+00> : vector<16x32xf32>
    %15 = tpu.matmul %13, %14, %cst_12 {dimension_numbers = #tpu.dot_dimension_numbers<[1], [0], [0], [1], [0, 0, 1, 1], [], []>} : vector<16x32xbf16>, vector<32x32xbf16>, vector<16x32xf32> -> vector<16x32xf32>
    %c0_13 = arith.constant 0 : index
    %c0_14 = arith.constant 0 : index
    %16 = vector.load %arg7[%c0_13, %c0_14] : memref<1x32xf32, #tpu.memory_space<vmem>>, vector<1x32xf32>
    %17 = vector.broadcast %16 : vector<1x32xf32> to vector<16x32xf32>
    %18 = arith.addf %15, %17 : vector<16x32xf32>
    %19 = math.tanh %18 : vector<16x32xf32>
    %c0_15 = arith.constant 0 : index
    %c0_16 = arith.constant 0 : index
    %20 = vector.load %arg8[%c0_15, %c0_16] : memref<1x32xf32, #tpu.memory_space<vmem>>, vector<1x32xf32>
    %21 = vector.broadcast %20 : vector<1x32xf32> to vector<16x32xf32>
    %22 = arith.mulf %19, %21 : vector<16x32xf32>
    %cst_17 = arith.constant dense<0.000000e+00> : vector<16xf32>
    %23 = vector.multi_reduction <add>, %22, %cst_17 [1] : vector<16x32xf32> to vector<16xf32>
    %24 = vector.shape_cast %23 : vector<16xf32> to vector<16x1xf32>
    %c0_18 = arith.constant 0 : index
    %25 = memref.load %arg9[%c0_18] : memref<1xf32, #tpu.memory_space<smem>>
    %26 = vector.broadcast %25 : f32 to vector<16x1xf32>
    %27 = arith.addf %24, %26 : vector<16x1xf32>
    %c0_19 = arith.constant 0 : index
    %c0_20 = arith.constant 0 : index
    %28 = vector.load %arg10[%c0_19, %c0_20] : memref<16x1xf32, #tpu.memory_space<vmem>>, vector<16x1xf32>
    tpu.vector_store %arg10[%c0_19, %c0_20], %27 {strides = array<i32>} : memref<16x1xf32, #tpu.memory_space<vmem>>, vector<16x1xf32>,
    return
  }
  func.func @transform_0(%arg0: i32) -> (i32, i32) {
    %c0_i32 = arith.constant 0 : i32
    %c0_i32_0 = arith.constant 0 : i32
    return %arg0, %c0_i32 : i32, i32
  }
  func.func @transform_1(%arg0: i32) -> (i32, i32) {
    %c0_i32 = arith.constant 0 : i32
    %c0_i32_0 = arith.constant 0 : i32
    return %arg0, %c0_i32 : i32, i32
  }
  func.func @transform_2(%arg0: i32) -> (i32, i32) {
    %c0_i32 = arith.constant 0 : i32
    %c0_i32_0 = arith.constant 0 : i32
    %c0_i32_1 = arith.constant 0 : i32
    return %c0_i32, %c0_i32_0 : i32, i32
  }
  func.func @transform_3(%arg0: i32) -> (i32, i32) {
    %c0_i32 = arith.constant 0 : i32
    %c0_i32_0 = arith.constant 0 : i32
    %c0_i32_1 = arith.constant 0 : i32
    return %c0_i32, %c0_i32_0 : i32, i32
  }
  func.func @transform_4(%arg0: i32) -> (i32, i32) {
    %c0_i32 = arith.constant 0 : i32
    %c0_i32_0 = arith.constant 0 : i32
    %c0_i32_1 = arith.constant 0 : i32
    return %c0_i32, %c0_i32_0 : i32, i32
  }
  func.func @transform_5(%arg0: i32) -> (i32, i32) {
    %c0_i32 = arith.constant 0 : i32
    %c0_i32_0 = arith.constant 0 : i32
    %c0_i32_1 = arith.constant 0 : i32
    return %c0_i32, %c0_i32_0 : i32, i32
  }
  func.func @transform_6(%arg0: i32) -> (i32, i32) {
    %c0_i32 = arith.constant 0 : i32
    %c0_i32_0 = arith.constant 0 : i32
    %c0_i32_1 = arith.constant 0 : i32
    return %c0_i32, %c0_i32_0 : i32, i32
  }
  func.func @transform_7(%arg0: i32) -> (i32, i32) {
    %c0_i32 = arith.constant 0 : i32
    %c0_i32_0 = arith.constant 0 : i32
    %c0_i32_1 = arith.constant 0 : i32
    return %c0_i32, %c0_i32_0 : i32, i32
  }
  func.func @transform_8(%arg0: i32) -> i32 {
    %c0_i32 = arith.constant 0 : i32
    %c0_i32_0 = arith.constant 0 : i32
    return %c0_i32 : i32
  }
  func.func @transform_9(%arg0: i32) -> (i32, i32) {
    %c0_i32 = arith.constant 0 : i32
    %c0_i32_0 = arith.constant 0 : i32
    return %arg0, %c0_i32 : i32, i32
  }
}

</mosaic_0001>

<bundles_post_ra>
// kernel: tpu_custom_call.1
= control target key start
LH: loop header
LB: loop body
LE: loop exit
PB: predicated region body
PF: predicated region fallthrough
CT: control target
= control target key end

     0   :  { %v467_v1 = vmov 0.0   ;;  %vm468_vm0 = vmmov 0   ;;  %vm83_vm1 = vcmask 130048   ;;  %vm300_vm2 = vcmask 261120   ;;  %s617_s2 = inlined_call_operand.vmem [shape: bf16[256,32], index: 2, kind: input, shape index: {}]   ;;  %s618_s3 = inlined_call_operand.vmem [shape: bf16[16,32], index: 3, kind: input, shape index: {}]   ;;  %s619_s0 = inlined_call_operand.vmem [shape: f32[16,256], index: 0, kind: input, shape index: {}]   ;;  %s620_s1 = inlined_call_operand.vmem [shape: f32[16,16], index: 1, kind: input, shape index: {}]   ;;  %s621_s5 = inlined_call_operand.vmem [shape: bf16[32,32], index: 5, kind: input, shape index: {}]   ;;  %s622_s4 = inlined_call_operand.vmem [shape: f32[1,32], index: 4, kind: input, shape index: {}]   ;;  %s623_s6 = inlined_call_operand.vmem [shape: f32[1,32], index: 6, kind: input, shape index: {}]   ;;  %s624_s7 = inlined_call_operand.vmem [shape: f32[1,32], index: 7, kind: input, shape index: {}]   ;;  %s625_s8 = inlined_call_operand.<no memory space> [shape: f32[1], index: 8, kind: input, shape index: {}]   ;;  %s626_s9 = inlined_call_operand.vmem [shape: f32[16,1], index: 9, kind: output, shape index: {}]  }
   0x1   :  { %v440_v0 = vld [vmem:[%s617_s2 + $0x40] sm:$0xff]   ;;  %424 = vmatprep.subr.bf16.mxu0 %v467_v1  ;;  %426 = vmatprep.mubr.msk.bf16.mxu0 %vm468_vm0, %v467_v1  ;;  %v442_v3 = vld [vmem:[%s617_s2 + $0x48] sm:$0xff]   ;;  %v444_v5 = vld [vmem:[%s617_s2 + $0x50] sm:$0xff]   ;;  %v363_v61 = vstv %s625_s8  ;;  %vm366_vm3 = vcmask 7168  }
   0x2   :  { %v441_v2 = vld [vmem:[%s617_s2] sm:$0xff]   ;;  %399 = vmatprep.subr.bf16.mxu1 %v440_v0  ;;  %v443_v4 = vld [vmem:[%s617_s2 + $0x8] sm:$0xff]   ;;  %v445_v6 = vld [vmem:[%s617_s2 + $0x10] sm:$0xff]  }
   0x3   :  { %400 = vmatpush3.bf16.msra.mxu1 %v441_v2  ;;  %v446_v7 = vld [vmem:[%s617_s2 + $0x58] sm:$0xff]   ;;  %v448_v9 = vld [vmem:[%s617_s2 + $0x60] sm:$0xff]   ;;  %v450_v12 = vld [vmem:[%s617_s2 + $0x68] sm:$0xff]  }
   0x4   :  { %401 = vmatprep.subr.bf16.mxu1 %v442_v3  ;;  %v447_v8 = vld [vmem:[%s617_s2 + $0x18] sm:$0xff]   ;;  %v449_v10 = vld [vmem:[%s617_s2 + $0x20] sm:$0xff]   ;;  %v35_v13 = vld [vmem:[%s619_s0 + $0x8] sm:$0xff] }
   0x5   :  { %v455_v11 = vld [vmem:[%s618_s3] sm:$0xff]   ;;  %v37_v14 = vld [vmem:[%s619_s0 + $0x18] sm:$0xff]  ;;  %v73_v17 = vld [vmem:[%s620_s1 + $0x8] sm:$0xff] }
   0x6   :  { %425 = vmatpush3.bf16.msra.mxu0 %v455_v11  ;;  %v72_v15 = vld [vmem:[%s620_s1] sm:$0xff]  ;;  %v39_v16 = vpack.c.bf16 %v37_v14, %v35_v13  ;;  %v451_v18 = vld [vmem:[%s617_s2 + $0x28] sm:$0xff]   ;;  %v452_v20 = vld [vmem:[%s617_s2 + $0x70] sm:$0xff]  }
   0x7   :  { %402 = vmatpush3.bf16.msra.mxu1 %v443_v4  ;;  %430 = vmatprep.subr.bf16.mxu0 %v467_v1  ;;  %v74_v19 = vpack.c.bf16 %v73_v17, %v72_v15  ;;  %v453_v21 = vld [vmem:[%s617_s2 + $0x30] sm:$0xff]   ;;  %v454_v22 = vld [vmem:[%s617_s2 + $0x78] sm:$0xff]   ;;  %v34_v24 = vld [vmem:[%s619_s0] sm:$0xff] }
   0x8   :  { %403 = vmatprep.subr.bf16.mxu1 %v444_v5  ;;  %256 = vmatprep.mubr.bf16.mxu1 %v39_v16  ;;  %v456_v23 = vld [vmem:[%s617_s2 + $0x38] sm:$0xff]   ;;  %v36_v25 = vld [vmem:[%s619_s0 + $0x10] sm:$0xff]  ;;  %v457_v27 = vld [vmem:[%s621_s5] sm:$0xff]  }
   0x9   :  { %427 = vmatmul.mubr.msk.bf16.vlgmr.msra.gmra.mrb[0].mxu0 %vm83_vm1, %v74_v19  ;;  %v38_v26 = vpack.c.bf16 %v36_v25, %v34_v24  ;;  %v458_v28 = vld [vmem:[%s621_s5 + $0x8] sm:$0xff]   ;;  %v391_v37 = vld [vmem:[%s622_s4] ss:$0 sm:$0xff] }
   0xa   :  { %434 = vmatprep.mubr.msk.bf16.mxu0 %vm468_vm0, %v467_v1  ;;  %431 = vmatpush3.bf16.msra.mxu0 %v457_v27  ;;  %v392_v47 = vld [vmem:[%s623_s6] ss:$0 sm:$0xff] }
   0xb   :  { %404 = vmatpush3.bf16.msra.mxu1 %v445_v6  ;;  %432 = vmatprep.subr.bf16.mxu0 %v467_v1  ;;  %v396_v54 = vld [vmem:[%s624_s7] ss:$0 sm:$0xff] }
   0xc   :  { %405 = vmatprep.subr.bf16.mxu1 %v446_v7 }
   0xe   :  { %433 = vmatpush3.bf16.msra.mxu0 %v458_v28 }
   0xf   :  { %406 = vmatpush3.bf16.msra.mxu1 %v447_v8 }
  0x10   :  { %407 = vmatprep.subr.bf16.mxu1 %v448_v9 }
  0x13   :  { %408 = vmatpush3.bf16.msra.mxu1 %v449_v10 }
  0x14   :  { %409 = vmatprep.subr.bf16.mxu1 %v450_v12 }
  0x17   :  { %410 = vmatpush3.bf16.msra.mxu1 %v451_v18 }
  0x18   :  { %411 = vmatprep.subr.bf16.mxu1 %v452_v20 }
  0x1b   :  { %412 = vmatpush3.bf16.msra.mxu1 %v453_v21 }
  0x1c   :  { %413 = vmatprep.subr.bf16.mxu1 %v454_v22 }
  0x1f   :  { %414 = vmatpush3.bf16.msra.mxu1 %v456_v23 }
  0x22   :  { %257 = vmatmul.mubr.bf16.vlgmr.msra.gmra.mrb[0].mxu1 %v38_v26 }
  0xdc   :  { %v121_v29 = vpop.f32.mrb[0].mxu0 }
  0xdd   :  { %v428_v30 = vpop.f32.mrb[1].mxu0 }
  0xde   :  { %v124_v31 = vpop.f32.mrb[2].mxu0 }
  0xdf   :  { %v429_v32 = vpop.f32.mrb[3].mxu0 }
  0xf5   :  { %v415_v33 = vpop.f32.mrb[0].mxu1 }
  0xf6   :  { %v416_v34 = vpop.f32.mrb[1].mxu1 }
  0xf7   :  { %v417_v35 = vadd.f32 %v416_v34, %v415_v33  ;;  %v418_v36 = vpop.f32.mrb[2].mxu1 }
  0xf8   :  { %v419_v38 = vpop.f32.mrb[3].mxu1 }
  0xf9   :  { %v259_v39 = vadd.f32 %v417_v35, %v121_v29  ;;  %v420_v40 = vadd.f32 %v419_v38, %v418_v36 }
  0xfb   :  { %v272_v41 = vadd.f32 %v391_v37, %v259_v39  ;;  %v262_v42 = vadd.f32 %v420_v40, %v124_v31 }
  0xfd   :  { %v273_v43 = vadd.f32 %v391_v37, %v262_v42  ;;  %459 = vtanh.f32 %v272_v41 }
  0xff   :  { %461 = vtanh.f32 %v273_v43 }
 0x107   :  { %v460_v44 = vpop.eup %459 }
 0x109   :  { %v462_v45 = vpop.eup %461 }
 0x10a   :  { %v276_v46 = vpack.c.bf16 %v462_v45, %v460_v44 }
 0x10c   :  { %435 = vmatmul.mubr.msk.bf16.vlgmr.msra.gmra.mrb[4].mxu0 %vm300_vm2, %v276_v46 }
 0x1df   :  { %v338_v48 = vpop.f32.mrb[4].mxu0 }
 0x1e0   :  { %v339_v49 = vadd.f32 %v392_v47, %v338_v48  ;;  %v436_v50 = vpop.f32.mrb[5].mxu0 }
 0x1e1   :  { %v341_v51 = vpop.f32.mrb[6].mxu0 }
 0x1e2   :  { %463 = vtanh.f32 %v339_v49  ;;  %v342_v52 = vadd.f32 %v392_v47, %v341_v51  ;;  %v437_v53 = vpop.f32.mrb[7].mxu0 }
 0x1e4   :  { %465 = vtanh.f32 %v342_v52 }
 0x1ec   :  { %v464_v55 = vpop.eup %463 }
 0x1ed   :  { %v354_v56 = vmul.f32 %v464_v55, %v396_v54 }
 0x1ee   :  { %v466_v57 = vpop.eup %465 }
 0x1ef   :  { %v356_v58 = vsel %vm300_vm2, %v354_v56, 0.0  ;;  %v355_v59 = vmul.f32 %v466_v57, %v396_v54 }
 0x1f0   :  { %357 = vadd.xlane.f32.xlu0 %v356_v58 }
 0x1f1   :  { %v359_v60 = vsel %vm300_vm2, %v355_v59, 0.0 }
 0x1f4   :  { %360 = vadd.xlane.f32.xlu0 %v359_v60 }
 0x27d   :  { %v358_v62 = vpop.xlane.xlu0 %357 }
 0x27e   :  { %v364_v63 = vadd.f32 %v363_v61, %v358_v62 }
 0x280   :  { %367 = vst.msk [vmem:[%s626_s9] sm:$0xff] %vm366_vm3, %v364_v63 }
 0x281   :  { %v361_v0 = vpop.xlane.xlu0 %360 }
 0x282   :  { %v365_v1 = vadd.f32 %v363_v61, %v361_v0 }
 0x284   :  { %368 = vst.msk [vmem:[%s626_s9 + $0x8] sm:$0xff] %vm366_vm3, %v365_v1 }

</bundles_post_ra>
